<compile_context>
chip_gen: v7x
topology: tpu7x:2x2x1
jax: 0.10.0
libtpu: 0.0.40
codegen_flags: <defaults>
</compile_context>

<pallas_src>
import functools

import jax
import jax.numpy as jnp
from jax.experimental import pallas as pl
from jax.experimental.pallas import tpu as pltpu


def _step_vmem_bytes(bb, Cmid, Cout, HW, K, itemsize=4):
    """Rough per-grid-step VMEM footprint: double-buffered in/out tiles + weights
    + live f32 temporaries."""
    cpk = bb * Cmid
    c_total = Cmid + Cout
    io = (cpk * 2 * HW + bb * c_total * HW) * itemsize
    wts = (cpk * cpk + (bb * Cout) * cpk + cpk * (K * K + 3)) * itemsize
    temps = 6 * cpk * HW * 4
    return 2 * io + 2 * wts + temps


def _choose_images_per_block(B, Cmid, Cout, HW, K,
                             target_step_bytes=1 << 20,
                             vmem_budget_bytes=24 << 20):
    """Largest Bb that (a) divides B, (b) keeps the packed sublane dims 8-aligned
    (or covers the whole batch), (c) fits a conservative VMEM budget (v7x has only
    64 MiB physical VMEM), (d) keeps >= 2 grid steps so dimension_semantics=
    ("parallel",) can use both v7x TensorCores, stopping once each step moves
    ~1 MiB of input (per-step pipeline overhead amortized)."""
    c_total = Cmid + Cout

    def ok(bb):
        if B % bb:
            return False
        if bb != B and ((bb * Cmid) % 8 or (bb * c_total) % 8):
            return False
        return _step_vmem_bytes(bb, Cmid, Cout, HW, K) <= vmem_budget_bytes

    best = None
    for bb in range(1, B + 1):
        if not ok(bb):
            continue
        if B // bb < 2 and best is not None:
            break                       # keep grid >= 2 once we have any option
        best = bb
        if bb * Cmid * 2 * HW * 4 >= target_step_bytes:
            break
    return best if best is not None else B


def shufflev2_kernel(x_ref, w1_ref, b1_ref, wd_ref, b2_ref, w3_ref, b3_ref,
                     out_ref, *, H, W, K, Bb, Cmid, Cout, matmul_dtype):
    # x_ref:   (Bb*Cmid, 2*H*W) -- per row: even channel lanes [0,HW), odd [HW,2HW)
    # out_ref: (Bb*(Cmid+Cout), H*W)
    HW = H * W
    P = K // 2
    C_total = Cmid + Cout

    xi = x_ref[...]                              # (Cpk, 2*HW) f32
    x_proj = xi[:, :HW]                          # identity branch (bit-exact f32)
    xb = xi[:, HW:]                              # branch_main input

    w1 = w1_ref[...]                             # (Cpk, Cpk) block-diag, BN folded
    w3 = w3_ref[...]                             # (Bb*Cout, Cpk) block-diag, BN folded
    wd = wd_ref[...]                             # (Cpk, K*K) per-channel taps, BN folded
    b1 = b1_ref[...]                             # (Cpk, 1)
    b2 = b2_ref[...]                             # (Cpk, 1)
    b3 = b3_ref[...]                             # (Bb*Cout, 1)

    # ---- 1x1 conv + bias + ReLU: ONE block-diagonal matmul for all Bb images ----
    y1 = jnp.dot(w1, xb.astype(matmul_dtype), preferred_element_type=jnp.float32)
    y1 = jnp.maximum(y1 + b1, 0.0)

    # ---- depthwise KxK 'same' conv: lane rolls (XLU) + (1,HW) border masks ----
    pcol = jax.lax.broadcasted_iota(jnp.int32, (1, HW), 1)   # flat spatial index
    if (W & (W - 1)) == 0:
        wcol = pcol & (W - 1)                                 # p % W, W power of two
    else:
        # TODO(synk): precompute the column index host-side for non-power-of-two W
        wcol = pcol % W

    ctr = P * K + P
    acc = y1 * wd[:, ctr:ctr + 1]                # center tap: no shift, no mask
    for dh in range(K):
        for dw in range(K):
            t = dh * K + dw
            if t == ctr:
                continue
            s = (dh - P) * W + (dw - P)          # flat-index offset of this tap
            shifted = pltpu.roll(y1, shift=(-s) % HW, axis=1)
            mask = None
            if dh < P:
                mask = pcol >= (P - dh) * W
            elif dh > P:
                mask = pcol < (H - (dh - P)) * W
            if dw < P:
                m = wcol >= (P - dw)
                mask = m if mask is None else (mask & m)
            elif dw > P:
                m = wcol < (W - (dw - P))
                mask = m if mask is None else (mask & m)
            if mask is not None:
                shifted = jnp.where(mask, shifted, 0.0)
            acc = acc + shifted * wd[:, t:t + 1]
    y2 = jnp.maximum(acc + b2, 0.0)

    # ---- 1x1 conv to branch_main_channels + bias + ReLU ----
    y3 = jnp.dot(w3, y2.astype(matmul_dtype), preferred_element_type=jnp.float32)
    y3 = jnp.maximum(y3 + b3, 0.0)

    # ---- concat([x_proj, branch_main], channel axis), per image in the pack ----
    if Cmid % 8 == 0 and Cout % 8 == 0:
        # Sublane-aligned: direct sub-stores, no temporary packed tile.
        for i in range(Bb):
            r = i * C_total
            out_ref[r:r + Cmid, :] = x_proj[i * Cmid:(i + 1) * Cmid, :]
            out_ref[r + Cmid:r + C_total, :] = y3[i * Cout:(i + 1) * Cout, :]
    else:
        # Misaligned channel counts: build the packed tile in registers and do a
        # single full-width, unmasked store.
        pieces = []
        for i in range(Bb):
            pieces.append(x_proj[i * Cmid:(i + 1) * Cmid, :])
            pieces.append(y3[i * Cout:(i + 1) * Cout, :])
        out_ref[...] = jnp.concatenate(pieces, axis=0)


def shufflev2_block_stride1(x_nchw, params, *, kernel_size=3,
                            matmul_dtype=jnp.float32, images_per_block=None):
    """x_nchw: (B, C, H, W) float32.  Returns (B, C_out, H, W) float32 (stride=1)."""
    B, C, H, W = x_nchw.shape
    assert C % 4 == 0
    Cmid = C // 2
    HW = H * W
    K = kernel_size
    # TODO(synk): pad HW to a multiple of 128 (and extend the border masks) for
    # real ShuffleNet spatial sizes (49/196/784); only HW % 128 == 0 handled here.
    assert HW % 128 == 0, "H*W must be a multiple of 128"

    w1, b1, wd, b2, w3, b3 = params              # BN already folded into w / b
    Cout = w3.shape[0]
    C_total = Cmid + Cout

    Bb = (images_per_block if images_per_block is not None
          else _choose_images_per_block(B, Cmid, Cout, HW, K))
    assert B % Bb == 0, "images_per_block must divide the batch"
    assert Bb == B or ((Bb * Cmid) % 8 == 0 and (Bb * C_total) % 8 == 0), \
        "images_per_block must keep the packed sublane dims 8-aligned"
    Cpk = Bb * Cmid

    # channel_shuffle as a free, contiguous reshape: original channel 2c+j of image b
    # -> row b*Cmid + c, lanes [j*HW, (j+1)*HW).  Images pack along sublanes so each
    # tile's sublane dim is Bb*Cmid (multiple of 8) instead of a half-empty vreg.
    x2 = x_nchw.astype(jnp.float32).reshape(B * Cmid, 2 * HW)

    # Block-diagonal weights: one matmul per 1x1 conv per grid step, all images.
    eye = jnp.eye(Bb, dtype=jnp.float32)
    w1_bd = jnp.kron(eye, w1.astype(jnp.float32)).astype(matmul_dtype)   # (Cpk, Cpk)
    w3_bd = jnp.kron(eye, w3.astype(jnp.float32)).astype(matmul_dtype)   # (Bb*Cout, Cpk)
    wd_pk = jnp.tile(wd.reshape(Cmid, K * K).astype(jnp.float32), (Bb, 1))
    b1_pk = jnp.tile(b1.astype(jnp.float32), Bb).reshape(Cpk, 1)
    b2_pk = jnp.tile(b2.astype(jnp.float32), Bb).reshape(Cpk, 1)
    b3_pk = jnp.tile(b3.astype(jnp.float32), Bb).reshape(Bb * Cout, 1)

    kernel = functools.partial(shufflev2_kernel, H=H, W=W, K=K, Bb=Bb,
                               Cmid=Cmid, Cout=Cout, matmul_dtype=matmul_dtype)

    full = lambda shape: pl.BlockSpec(shape, lambda g: (0,) * len(shape))
    vmem_limit = int(min(max(_step_vmem_bytes(Bb, Cmid, Cout, HW, K) + (4 << 20),
                             32 << 20), 48 << 20))

    out = pl.pallas_call(
        kernel,
        out_shape=jax.ShapeDtypeStruct((B * C_total, HW), jnp.float32),
        grid_spec=pltpu.PrefetchScalarGridSpec(
            num_scalar_prefetch=0,
            grid=(B // Bb,),
            in_specs=[
                pl.BlockSpec((Cpk, 2 * HW), lambda g: (g, 0)),   # shuffled packed x
                full((Cpk, Cpk)),            # w1 block-diag (BN scale folded)
                full((Cpk, 1)),              # b1
                full((Cpk, K * K)),          # wd (BN scale folded)
                full((Cpk, 1)),              # b2
                full((Bb * Cout, Cpk)),      # w3 block-diag (BN scale folded)
                full((Bb * Cout, 1)),        # b3
            ],
            out_specs=pl.BlockSpec((Bb * C_total, HW), lambda g: (g, 0)),
        ),
        compiler_params=pltpu.CompilerParams(
            dimension_semantics=("parallel",),
            vmem_limit_bytes=vmem_limit),
    )(x2, w1_bd, b1_pk, wd_pk, b2_pk, w3_bd, b3_pk)

    return out.reshape(B, C_total, H, W)             # free reshape back to NCHW


def _fold_bn(gamma, beta, mean, var, eps=1e-5):
    scale = gamma / jnp.sqrt(var + eps)
    bias = beta - mean * scale
    return scale, bias


def make_params(key, in_channels, out_channels, kernel_size):
    """Synthetic params (PyTorch [out,in] layout) with eval-mode BN folded in."""
    Cmid = in_channels // 2
    Cout_main = out_channels - Cmid
    ks = jax.random.split(key, 6)

    w1 = jax.random.normal(ks[0], (Cmid, Cmid), jnp.float32) * 0.3
    wd = jax.random.normal(ks[1], (Cmid, kernel_size, kernel_size), jnp.float32) * 0.3
    w3 = jax.random.normal(ks[2], (Cout_main, Cmid), jnp.float32) * 0.3

    def bn(k, n):
        k1, k2, k3, k4 = jax.random.split(k, 4)
        gamma = 1.0 + 0.1 * jax.random.normal(k1, (n,), jnp.float32)
        beta = 0.1 * jax.random.normal(k2, (n,), jnp.float32)
        mean = 0.1 * jax.random.normal(k3, (n,), jnp.float32)
        var = 1.0 + 0.1 * jax.nn.softplus(jax.random.normal(k4, (n,), jnp.float32))
        return _fold_bn(gamma, beta, mean, var)

    s1, b1 = bn(ks[3], Cmid)
    s2, b2 = bn(ks[4], Cmid)
    s3, b3 = bn(ks[5], Cout_main)

    w1f = w1 * s1[:, None]
    wdf = wd * s2[:, None, None]
    w3f = w3 * s3[:, None]
    return (w1f, b1, wdf, b2, w3f, b3)


def reference_forward(x_nchw, params, kernel_size):
    """Pure-JAX f32 reference mirroring the PyTorch forward (stride=1, eval BN)."""
    w1, b1, wd, b2, w3, b3 = params
    K, P = kernel_size, kernel_size // 2
    B, C, H, W = x_nchw.shape
    Cmid = C // 2
    hp = jax.lax.Precision.HIGHEST

    xr = x_nchw.reshape(B, Cmid, 2, H * W)
    x_proj = xr[:, :, 0, :].reshape(B, Cmid, H, W)
    xb = xr[:, :, 1, :].reshape(B, Cmid, H, W)

    y = jnp.einsum('oc,bchw->bohw', w1, xb, precision=hp)
    y = jnp.maximum(y + b1[None, :, None, None], 0.0)

    yp = jnp.pad(y, ((0, 0), (0, 0), (P, P), (P, P)))
    acc = jnp.zeros_like(y)
    for dh in range(K):
        for dw in range(K):
            acc = acc + yp[:, :, dh:dh + H, dw:dw + W] * wd[:, dh, dw][None, :, None, None]
    y = jnp.maximum(acc + b2[None, :, None, None], 0.0)

    y = jnp.einsum('oc,bchw->bohw', w3, y, precision=hp)
    y = jnp.maximum(y + b3[None, :, None, None], 0.0)

    return jnp.concatenate([x_proj, y], axis=1)


if __name__ == "__main__":
    key = jax.random.PRNGKey(0)
    kx, kp, kx2, kp2 = jax.random.split(key, 4)

    # Config 1: Cmid=4 (not 8-aligned) -> packed tile, concat store path, grid=2.
    B, C, H, W = 8, 8, 16, 16
    kernel_size = 3
    x = jax.random.normal(kx, (B, C, H, W), jnp.float32)
    params = make_params(kp, C, C, kernel_size)

    fn = jax.jit(functools.partial(shufflev2_block_stride1, kernel_size=kernel_size))
    out = fn(x, params)
    jax.block_until_ready(out)

    ref = reference_forward(x, params, kernel_size)
    assert out.shape == (B, C, H, W)
    err = float(jnp.max(jnp.abs(out - ref)))
    assert jnp.allclose(out, ref, atol=1e-3, rtol=1e-3), f"config1 max err {err}"

    # Config 2: Cmid=16 (8-aligned) -> direct sub-store path, grid=2.
    B2, C2, H2, W2 = 4, 32, 16, 8
    x2 = jax.random.normal(kx2, (B2, C2, H2, W2), jnp.float32)
    params2 = make_params(kp2, C2, C2, kernel_size)
    out2 = fn(x2, params2)
    jax.block_until_ready(out2)

    ref2 = reference_forward(x2, params2, kernel_size)
    assert out2.shape == (B2, C2, H2, W2)
    err2 = float(jnp.max(jnp.abs(out2 - ref2)))
    assert jnp.allclose(out2, ref2, atol=1e-3, rtol=1e-3), f"config2 max err {err2}"

    print("KERNEL_OK")
</pallas_src>

<mosaic_0001>
module attributes {stable_mosaic.version = 11 : i64} {
  func.func @shufflev2_kernel(%arg0: i32, %arg1: memref<16x512xf32, #tpu.memory_space<vmem>>, %arg2: memref<16x16xf32, #tpu.memory_space<vmem>>, %arg3: memref<16x1xf32, #tpu.memory_space<vmem>>, %arg4: memref<16x9xf32, #tpu.memory_space<vmem>>, %arg5: memref<16x1xf32, #tpu.memory_space<vmem>>, %arg6: memref<16x16xf32, #tpu.memory_space<vmem>>, %arg7: memref<16x1xf32, #tpu.memory_space<vmem>>, %arg8: memref<32x256xf32, #tpu.memory_space<vmem>>) attributes {dimension_semantics = [#tpu.dimension_semantics<parallel>], iteration_bounds = array<i64: 2>, scalar_prefetch = 0 : i64, scratch_operands = 0 : i64, tpu.core_type = #tpu.core_type<tc>, window_params = [{transform_indices = @transform_0, window_bounds = array<i64: 16, 512>}, {pipeline_mode = #tpu.pipeline_mode<synchronous>, transform_indices = @transform_1, window_bounds = array<i64: 16, 16>}, {pipeline_mode = #tpu.pipeline_mode<synchronous>, transform_indices = @transform_2, window_bounds = array<i64: 16, 1>}, {pipeline_mode = #tpu.pipeline_mode<synchronous>, transform_indices = @transform_3, window_bounds = array<i64: 16, 9>}, {pipeline_mode = #tpu.pipeline_mode<synchronous>, transform_indices = @transform_4, window_bounds = array<i64: 16, 1>}, {pipeline_mode = #tpu.pipeline_mode<synchronous>, transform_indices = @transform_5, window_bounds = array<i64: 16, 16>}, {pipeline_mode = #tpu.pipeline_mode<synchronous>, transform_indices = @transform_6, window_bounds = array<i64: 16, 1>}, {transform_indices = @transform_7, window_bounds = array<i64: 32, 256>}]} {
    %c0 = arith.constant 0 : index
    %c0_0 = arith.constant 0 : index
    %0 = vector.load %arg1[%c0, %c0_0] : memref<16x512xf32, #tpu.memory_space<vmem>>, vector<16x512xf32>
    %1 = vector.extract_strided_slice %0 {offsets = [0, 0], sizes = [16, 256], strides = [1, 1]} : vector<16x512xf32> to vector<16x256xf32>
    %2 = vector.extract_strided_slice %0 {offsets = [0, 256], sizes = [16, 256], strides = [1, 1]} : vector<16x512xf32> to vector<16x256xf32>
    %c0_1 = arith.constant 0 : index
    %c0_2 = arith.constant 0 : index
    %3 = vector.load %arg2[%c0_1, %c0_2] : memref<16x16xf32, #tpu.memory_space<vmem>>, vector<16x16xf32>
    %c0_3 = arith.constant 0 : index
    %c0_4 = arith.constant 0 : index
    %4 = vector.load %arg6[%c0_3, %c0_4] : memref<16x16xf32, #tpu.memory_space<vmem>>, vector<16x16xf32>
    %c0_5 = arith.constant 0 : index
    %c0_6 = arith.constant 0 : index
    %5 = vector.load %arg4[%c0_5, %c0_6] : memref<16x9xf32, #tpu.memory_space<vmem>>, vector<16x9xf32>
    %c0_7 = arith.constant 0 : index
    %c0_8 = arith.constant 0 : index
    %6 = vector.load %arg3[%c0_7, %c0_8] : memref<16x1xf32, #tpu.memory_space<vmem>>, vector<16x1xf32>
    %c0_9 = arith.constant 0 : index
    %c0_10 = arith.constant 0 : index
    %7 = vector.load %arg5[%c0_9, %c0_10] : memref<16x1xf32, #tpu.memory_space<vmem>>, vector<16x1xf32>
    %c0_11 = arith.constant 0 : index
    %c0_12 = arith.constant 0 : index
    %8 = vector.load %arg7[%c0_11, %c0_12] : memref<16x1xf32, #tpu.memory_space<vmem>>, vector<16x1xf32>
    %cst = arith.constant dense<0.000000e+00> : vector<16x256xf32>
    %9 = tpu.matmul %3, %2, %cst {dimension_numbers = #tpu.dot_dimension_numbers<[1], [0], [0], [1], [0, 0, 1, 1], [], []>} : vector<16x16xf32>, vector<16x256xf32>, vector<16x256xf32> -> vector<16x256xf32>
    %10 = vector.broadcast %6 : vector<16x1xf32> to vector<16x256xf32>
    %11 = arith.addf %9, %10 : vector<16x256xf32>
    %cst_13 = arith.constant 0.000000e+00 : f32
    %12 = vector.broadcast %cst_13 : f32 to vector<16x256xf32>
    %13 = arith.maximumf %11, %12 : vector<16x256xf32>
    %14 = tpu.iota {dimensions = array<i32: 1>} : vector<1x256xi32>
    %c15_i32 = arith.constant 15 : i32
    %15 = vector.broadcast %c15_i32 : i32 to vector<1x256xi32>
    %16 = arith.andi %14, %15 : vector<1x256xi32>
    %17 = vector.extract_strided_slice %5 {offsets = [0, 4], sizes = [16, 1], strides = [1, 1]} : vector<16x9xf32> to vector<16x1xf32>
    %18 = vector.broadcast %17 : vector<16x1xf32> to vector<16x256xf32>
    %19 = arith.mulf %13, %18 : vector<16x256xf32>
    %c17_i32 = arith.constant 17 : i32
    %20 = tpu.dynamic_rotate %13 by %c17_i32 dim 1 : vector<16x256xf32>, i32 -> vector<16x256xf32>
    %c16_i32 = arith.constant 16 : i32
    %21 = vector.broadcast %c16_i32 : i32 to vector<1x256xi32>
    %22 = arith.cmpi sge, %14, %21 : vector<1x256xi32>
    %c1_i32 = arith.constant 1 : i32
    %23 = vector.broadcast %c1_i32 : i32 to vector<1x256xi32>
    %24 = arith.cmpi sge, %16, %23 : vector<1x256xi32>
    %25 = arith.andi %22, %24 : vector<1x256xi1>
    %cst_14 = arith.constant 0.000000e+00 : f32
    %26 = vector.shape_cast %25 : vector<1x256xi1> to vector<1x256xi1>
    %27 = vector.broadcast %26 : vector<1x256xi1> to vector<16x256xi1>
    %28 = vector.broadcast %cst_14 : f32 to vector<16x256xf32>
    %29 = arith.select %27, %20, %28 : vector<16x256xi1>, vector<16x256xf32>
    %30 = vector.extract_strided_slice %5 {offsets = [0, 0], sizes = [16, 1], strides = [1, 1]} : vector<16x9xf32> to vector<16x1xf32>
    %31 = vector.broadcast %30 : vector<16x1xf32> to vector<16x256xf32>
    %32 = arith.mulf %29, %31 : vector<16x256xf32>
    %33 = arith.addf %19, %32 : vector<16x256xf32>
    %c16_i32_15 = arith.constant 16 : i32
    %34 = tpu.dynamic_rotate %13 by %c16_i32_15 dim 1 : vector<16x256xf32>, i32 -> vector<16x256xf32>
    %c16_i32_16 = arith.constant 16 : i32
    %35 = vector.broadcast %c16_i32_16 : i32 to vector<1x256xi32>
    %36 = arith.cmpi sge, %14, %35 : vector<1x256xi32>
    %cst_17 = arith.constant 0.000000e+00 : f32
    %37 = vector.shape_cast %36 : vector<1x256xi1> to vector<1x256xi1>
    %38 = vector.broadcast %37 : vector<1x256xi1> to vector<16x256xi1>
    %39 = vector.broadcast %cst_17 : f32 to vector<16x256xf32>
    %40 = arith.select %38, %34, %39 : vector<16x256xi1>, vector<16x256xf32>
    %41 = vector.extract_strided_slice %5 {offsets = [0, 1], sizes = [16, 1], strides = [1, 1]} : vector<16x9xf32> to vector<16x1xf32>
    %42 = vector.broadcast %41 : vector<16x1xf32> to vector<16x256xf32>
    %43 = arith.mulf %40, %42 : vector<16x256xf32>
    %44 = arith.addf %33, %43 : vector<16x256xf32>
    %c15_i32_18 = arith.constant 15 : i32
    %45 = tpu.dynamic_rotate %13 by %c15_i32_18 dim 1 : vector<16x256xf32>, i32 -> vector<16x256xf32>
    %c16_i32_19 = arith.constant 16 : i32
    %46 = vector.broadcast %c16_i32_19 : i32 to vector<1x256xi32>
    %47 = arith.cmpi sge, %14, %46 : vector<1x256xi32>
    %c15_i32_20 = arith.constant 15 : i32
    %48 = vector.broadcast %c15_i32_20 : i32 to vector<1x256xi32>
    %49 = arith.cmpi slt, %16, %48 : vector<1x256xi32>
    %50 = arith.andi %47, %49 : vector<1x256xi1>
    %cst_21 = arith.constant 0.000000e+00 : f32
    %51 = vector.shape_cast %50 : vector<1x256xi1> to vector<1x256xi1>
    %52 = vector.broadcast %51 : vector<1x256xi1> to vector<16x256xi1>
    %53 = vector.broadcast %cst_21 : f32 to vector<16x256xf32>
    %54 = arith.select %52, %45, %53 : vector<16x256xi1>, vector<16x256xf32>
    %55 = vector.extract_strided_slice %5 {offsets = [0, 2], sizes = [16, 1], strides = [1, 1]} : vector<16x9xf32> to vector<16x1xf32>
    %56 = vector.broadcast %55 : vector<16x1xf32> to vector<16x256xf32>
    %57 = arith.mulf %54, %56 : vector<16x256xf32>
    %58 = arith.addf %44, %57 : vector<16x256xf32>
    %c1_i32_22 = arith.constant 1 : i32
    %59 = tpu.dynamic_rotate %13 by %c1_i32_22 dim 1 : vector<16x256xf32>, i32 -> vector<16x256xf32>
    %c1_i32_23 = arith.constant 1 : i32
    %60 = vector.broadcast %c1_i32_23 : i32 to vector<1x256xi32>
    %61 = arith.cmpi sge, %16, %60 : vector<1x256xi32>
    %cst_24 = arith.constant 0.000000e+00 : f32
    %62 = vector.shape_cast %61 : vector<1x256xi1> to vector<1x256xi1>
    %63 = vector.broadcast %62 : vector<1x256xi1> to vector<16x256xi1>
    %64 = vector.broadcast %cst_24 : f32 to vector<16x256xf32>
    %65 = arith.select %63, %59, %64 : vector<16x256xi1>, vector<16x256xf32>
    %66 = vector.extract_strided_slice %5 {offsets = [0, 3], sizes = [16, 1], strides = [1, 1]} : vector<16x9xf32> to vector<16x1xf32>
    %67 = vector.broadcast %66 : vector<16x1xf32> to vector<16x256xf32>
    %68 = arith.mulf %65, %67 : vector<16x256xf32>
    %69 = arith.addf %58, %68 : vector<16x256xf32>
    %c255_i32 = arith.constant 255 : i32
    %70 = tpu.dynamic_rotate %13 by %c255_i32 dim 1 : vector<16x256xf32>, i32 -> vector<16x256xf32>
    %c15_i32_25 = arith.constant 15 : i32
    %71 = vector.broadcast %c15_i32_25 : i32 to vector<1x256xi32>
    %72 = arith.cmpi slt, %16, %71 : vector<1x256xi32>
    %cst_26 = arith.constant 0.000000e+00 : f32
    %73 = vector.shape_cast %72 : vector<1x256xi1> to vector<1x256xi1>
    %74 = vector.broadcast %73 : vector<1x256xi1> to vector<16x256xi1>
    %75 = vector.broadcast %cst_26 : f32 to vector<16x256xf32>
    %76 = arith.select %74, %70, %75 : vector<16x256xi1>, vector<16x256xf32>
    %77 = vector.extract_strided_slice %5 {offsets = [0, 5], sizes = [16, 1], strides = [1, 1]} : vector<16x9xf32> to vector<16x1xf32>
    %78 = vector.broadcast %77 : vector<16x1xf32> to vector<16x256xf32>
    %79 = arith.mulf %76, %78 : vector<16x256xf32>
    %80 = arith.addf %69, %79 : vector<16x256xf32>
    %c241_i32 = arith.constant 241 : i32
    %81 = tpu.dynamic_rotate %13 by %c241_i32 dim 1 : vector<16x256xf32>, i32 -> vector<16x256xf32>
    %c240_i32 = arith.constant 240 : i32
    %82 = vector.broadcast %c240_i32 : i32 to vector<1x256xi32>
    %83 = arith.cmpi slt, %14, %82 : vector<1x256xi32>
    %c1_i32_27 = arith.constant 1 : i32
    %84 = vector.broadcast %c1_i32_27 : i32 to vector<1x256xi32>
    %85 = arith.cmpi sge, %16, %84 : vector<1x256xi32>
    %86 = arith.andi %83, %85 : vector<1x256xi1>
    %cst_28 = arith.constant 0.000000e+00 : f32
    %87 = vector.shape_cast %86 : vector<1x256xi1> to vector<1x256xi1>
    %88 = vector.broadcast %87 : vector<1x256xi1> to vector<16x256xi1>
    %89 = vector.broadcast %cst_28 : f32 to vector<16x256xf32>
    %90 = arith.select %88, %81, %89 : vector<16x256xi1>, vector<16x256xf32>
    %91 = vector.extract_strided_slice %5 {offsets = [0, 6], sizes = [16, 1], strides = [1, 1]} : vector<16x9xf32> to vector<16x1xf32>
    %92 = vector.broadcast %91 : vector<16x1xf32> to vector<16x256xf32>
    %93 = arith.mulf %90, %92 : vector<16x256xf32>
    %94 = arith.addf %80, %93 : vector<16x256xf32>
    %c240_i32_29 = arith.constant 240 : i32
    %95 = tpu.dynamic_rotate %13 by %c240_i32_29 dim 1 : vector<16x256xf32>, i32 -> vector<16x256xf32>
    %c240_i32_30 = arith.constant 240 : i32
    %96 = vector.broadcast %c240_i32_30 : i32 to vector<1x256xi32>
    %97 = arith.cmpi slt, %14, %96 : vector<1x256xi32>
    %cst_31 = arith.constant 0.000000e+00 : f32
    %98 = vector.shape_cast %97 : vector<1x256xi1> to vector<1x256xi1>
    %99 = vector.broadcast %98 : vector<1x256xi1> to vector<16x256xi1>
    %100 = vector.broadcast %cst_31 : f32 to vector<16x256xf32>
    %101 = arith.select %99, %95, %100 : vector<16x256xi1>, vector<16x256xf32>
    %102 = vector.extract_strided_slice %5 {offsets = [0, 7], sizes = [16, 1], strides = [1, 1]} : vector<16x9xf32> to vector<16x1xf32>
    %103 = vector.broadcast %102 : vector<16x1xf32> to vector<16x256xf32>
    %104 = arith.mulf %101, %103 : vector<16x256xf32>
    %105 = arith.addf %94, %104 : vector<16x256xf32>
    %c239_i32 = arith.constant 239 : i32
    %106 = tpu.dynamic_rotate %13 by %c239_i32 dim 1 : vector<16x256xf32>, i32 -> vector<16x256xf32>
    %c240_i32_32 = arith.constant 240 : i32
    %107 = vector.broadcast %c240_i32_32 : i32 to vector<1x256xi32>
    %108 = arith.cmpi slt, %14, %107 : vector<1x256xi32>
    %c15_i32_33 = arith.constant 15 : i32
    %109 = vector.broadcast %c15_i32_33 : i32 to vector<1x256xi32>
    %110 = arith.cmpi slt, %16, %109 : vector<1x256xi32>
    %111 = arith.andi %108, %110 : vector<1x256xi1>
    %cst_34 = arith.constant 0.000000e+00 : f32
    %112 = vector.shape_cast %111 : vector<1x256xi1> to vector<1x256xi1>
    %113 = vector.broadcast %112 : vector<1x256xi1> to vector<16x256xi1>
    %114 = vector.broadcast %cst_34 : f32 to vector<16x256xf32>
    %115 = arith.select %113, %106, %114 : vector<16x256xi1>, vector<16x256xf32>
    %116 = vector.extract_strided_slice %5 {offsets = [0, 8], sizes = [16, 1], strides = [1, 1]} : vector<16x9xf32> to vector<16x1xf32>
    %117 = vector.broadcast %116 : vector<16x1xf32> to vector<16x256xf32>
    %118 = arith.mulf %115, %117 : vector<16x256xf32>
    %119 = arith.addf %105, %118 : vector<16x256xf32>
    %120 = vector.broadcast %7 : vector<16x1xf32> to vector<16x256xf32>
    %121 = arith.addf %119, %120 : vector<16x256xf32>
    %cst_35 = arith.constant 0.000000e+00 : f32
    %122 = vector.broadcast %cst_35 : f32 to vector<16x256xf32>
    %123 = arith.maximumf %121, %122 : vector<16x256xf32>
    %cst_36 = arith.constant dense<0.000000e+00> : vector<16x256xf32>
    %124 = tpu.matmul %4, %123, %cst_36 {dimension_numbers = #tpu.dot_dimension_numbers<[1], [0], [0], [1], [0, 0, 1, 1], [], []>} : vector<16x16xf32>, vector<16x256xf32>, vector<16x256xf32> -> vector<16x256xf32>
    %125 = vector.broadcast %8 : vector<16x1xf32> to vector<16x256xf32>
    %126 = arith.addf %124, %125 : vector<16x256xf32>
    %cst_37 = arith.constant 0.000000e+00 : f32
    %127 = vector.broadcast %cst_37 : f32 to vector<16x256xf32>
    %128 = arith.maximumf %126, %127 : vector<16x256xf32>
    %129 = vector.extract_strided_slice %1 {offsets = [0, 0], sizes = [4, 256], strides = [1, 1]} : vector<16x256xf32> to vector<4x256xf32>
    %130 = vector.extract_strided_slice %128 {offsets = [0, 0], sizes = [4, 256], strides = [1, 1]} : vector<16x256xf32> to vector<4x256xf32>
    %131 = vector.extract_strided_slice %1 {offsets = [4, 0], sizes = [4, 256], strides = [1, 1]} : vector<16x256xf32> to vector<4x256xf32>
    %132 = vector.extract_strided_slice %128 {offsets = [4, 0], sizes = [4, 256], strides = [1, 1]} : vector<16x256xf32> to vector<4x256xf32>
    %133 = vector.extract_strided_slice %1 {offsets = [8, 0], sizes = [4, 256], strides = [1, 1]} : vector<16x256xf32> to vector<4x256xf32>
    %134 = vector.extract_strided_slice %128 {offsets = [8, 0], sizes = [4, 256], strides = [1, 1]} : vector<16x256xf32> to vector<4x256xf32>
    %135 = vector.extract_strided_slice %1 {offsets = [12, 0], sizes = [4, 256], strides = [1, 1]} : vector<16x256xf32> to vector<4x256xf32>
    %136 = vector.extract_strided_slice %128 {offsets = [12, 0], sizes = [4, 256], strides = [1, 1]} : vector<16x256xf32> to vector<4x256xf32>
    %137 = tpu.concatenate %129, %130, %131, %132, %133, %134, %135, %136 in 0 : vector<4x256xf32>, vector<4x256xf32>, vector<4x256xf32>, vector<4x256xf32>, vector<4x256xf32>, vector<4x256xf32>, vector<4x256xf32>, vector<4x256xf32> -> vector<32x256xf32>
    %c0_38 = arith.constant 0 : index
    %c0_39 = arith.constant 0 : index
    %138 = vector.load %arg8[%c0_38, %c0_39] : memref<32x256xf32, #tpu.memory_space<vmem>>, vector<32x256xf32>
    tpu.vector_store %arg8[%c0_38, %c0_39], %137 {strides = array<i32>} : memref<32x256xf32, #tpu.memory_space<vmem>>, vector<32x256xf32>,
    return
  }
  func.func @transform_0(%arg0: i32) -> (i32, i32) {
    %c0_i32 = arith.constant 0 : i32
    %c0_i32_0 = arith.constant 0 : i32
    return %arg0, %c0_i32 : i32, i32
  }
  func.func @transform_1(%arg0: i32) -> (i32, i32) {
    %c0_i32 = arith.constant 0 : i32
    %c0_i32_0 = arith.constant 0 : i32
    %c0_i32_1 = arith.constant 0 : i32
    return %c0_i32, %c0_i32_0 : i32, i32
  }
  func.func @transform_2(%arg0: i32) -> (i32, i32) {
    %c0_i32 = arith.constant 0 : i32
    %c0_i32_0 = arith.constant 0 : i32
    %c0_i32_1 = arith.constant 0 : i32
    return %c0_i32, %c0_i32_0 : i32, i32
  }
  func.func @transform_3(%arg0: i32) -> (i32, i32) {
    %c0_i32 = arith.constant 0 : i32
    %c0_i32_0 = arith.constant 0 : i32
    %c0_i32_1 = arith.constant 0 : i32
    return %c0_i32, %c0_i32_0 : i32, i32
  }
  func.func @transform_4(%arg0: i32) -> (i32, i32) {
    %c0_i32 = arith.constant 0 : i32
    %c0_i32_0 = arith.constant 0 : i32
    %c0_i32_1 = arith.constant 0 : i32
    return %c0_i32, %c0_i32_0 : i32, i32
  }
  func.func @transform_5(%arg0: i32) -> (i32, i32) {
    %c0_i32 = arith.constant 0 : i32
    %c0_i32_0 = arith.constant 0 : i32
    %c0_i32_1 = arith.constant 0 : i32
    return %c0_i32, %c0_i32_0 : i32, i32
  }
  func.func @transform_6(%arg0: i32) -> (i32, i32) {
    %c0_i32 = arith.constant 0 : i32
    %c0_i32_0 = arith.constant 0 : i32
    %c0_i32_1 = arith.constant 0 : i32
    return %c0_i32, %c0_i32_0 : i32, i32
  }
  func.func @transform_7(%arg0: i32) -> (i32, i32) {
    %c0_i32 = arith.constant 0 : i32
    %c0_i32_0 = arith.constant 0 : i32
    return %arg0, %c0_i32 : i32, i32
  }
}

</mosaic_0001>

<bundles_post_ra>
// kernel: tile.26
= control target key start
LH: loop header
LB: loop body
LE: loop exit
PB: predicated region body
PF: predicated region fallthrough
CT: control target
= control target key end

     0   :  { %s22_s0 = inlined_call_operand.vmem [shape: f32[4], index: 0, kind: input, shape index: {}]   ;;  %s23_s1 = inlined_call_operand.vmem [shape: f32[4,4], index: 1, kind: output, shape index: {}]  }
   0x1   :  { %v4_v0 = vld [vmem:[%s22_s0] ss:$0 sm:$0xff] }
   0x2   :  { %5 = vst [vmem:[%s23_s1] sm:$0xf] %v4_v0 }

// kernel: tile.2
= control target key start
LH: loop header
LB: loop body
LE: loop exit
PB: predicated region body
PF: predicated region fallthrough
CT: control target
= control target key end

     0   :  { %s34_s8 = smov 125   ;;  %vm7_vm0 = vcmask 7168   ;;  %s35_s11 = smov 126   ;;  %s61_s0 = inlined_call_operand.vmem [shape: f32[4,4], index: 0, kind: input, shape index: {}]   ;;  %s62_s1 = inlined_call_operand.vmem [shape: f32[16,1], index: 1, kind: output, shape index: {}]  }
   0x1   :  { %v4_v0 = vld [vmem:[%s61_s0] sm:$0xf]  ;;  %s33_s0 = smov 127  }
   0x2   :  { %5 = vst [vmem:[#allocation0] sm:$0xf] %v4_v0 }
   0x9   :  { %v9_v1 = vld [vmem:[#allocation0] sm:$0xf]  }
   0xa   :  { %v21_v2 = vld [vmem:[#allocation0] sm:$0xf]   ;;  %10 = vrot.lane.b32.xlu0 %v9_v1, %s33_s0 }
   0xb   :  { %22 = vrot.lane.b32.xlu1 %v21_v2, %s34_s8  ;;  %v6_v3 = vld [vmem:[#allocation0] sm:$0xf]  }
   0xc   :  { %v15_v4 = vld [vmem:[#allocation0] sm:$0xf]   ;;  %8 = vst.msk [vmem:[%s62_s1] ss:$4 sm:$0xf] %vm7_vm0, %v6_v3  }
   0xe   :  { %16 = vrot.lane.b32.xlu0 %v15_v4, %s35_s11 }
  0x7c   :  { %v11_v5 = vpop.permute.xlu0 %10  }
  0x7d   :  { %v23_v6 = vpop.permute.xlu1 %22   ;;  %27 = vst.msk [vmem:[%s62_s1 + $0x1] ss:$4 sm:$0xf] %vm7_vm0, %v11_v5  }
  0x7e   :  { %29 = vst.msk [vmem:[%s62_s1 + $0x3] ss:$4 sm:$0xf] %vm7_vm0, %v23_v6  }
  0x80   :  { %v17_v7 = vpop.permute.xlu0 %16  }
  0x81   :  { %28 = vst.msk [vmem:[%s62_s1 + $0x2] ss:$4 sm:$0xf] %vm7_vm0, %v17_v7  }

// kernel: shufflev2_block_stride1.1
= control target key start
LH: loop header
LB: loop body
LE: loop exit
PB: predicated region body
PF: predicated region fallthrough
CT: control target
= control target key end

     0   :  { %s1088_s24 = smov 0   ;;  %s1563_s0 = inlined_call_operand.vmem [shape: f32[32,512], index: 0, kind: input, shape index: {}]   ;;  %s1564_s1 = inlined_call_operand.vmem [shape: f32[16,16], index: 1, kind: input, shape index: {}]   ;;  %s1565_s2 = inlined_call_operand.vmem [shape: f32[16,1], index: 2, kind: input, shape index: {}]   ;;  %s1566_s3 = inlined_call_operand.vmem [shape: f32[16,9], index: 3, kind: input, shape index: {}]   ;;  %s1567_s4 = inlined_call_operand.vmem [shape: f32[16,1], index: 4, kind: input, shape index: {}]   ;;  %s1568_s5 = inlined_call_operand.vmem [shape: f32[16,16], index: 5, kind: input, shape index: {}]   ;;  %s1569_s6 = inlined_call_operand.vmem [shape: f32[16,1], index: 6, kind: input, shape index: {}]   ;;  %s1570_s7 = inlined_call_operand.vmem [shape: f32[64,256], index: 7, kind: output, shape index: {}]  }
   0x1 LB: > { %s950_s25 = sadd.s32 4294967295, %s1028_s24   ;;  %p954_p0 = scmp.ge.s32.totalorder %s1028_s24, 1  ;;  %s1028_s24 = sphi %s1088_s24, %s17_s24  }
   0x2   : > { %p239_p1 = scmp.lt.s32.totalorder %s1028_s24, 3 }
   0x4   : > { %p240_p2 = pnand %p954_p0, %p239_p1 }
   0x5   : > { %s955_s26 = sshll.u32 (!%p240_p2), %s950_s25, 1  ;;  %v1030_v0 = vmov (!%p240_p2), 0.0   ;;  %v1031_v1 = vmov (!%p240_p2), 0   ;;  %v301_v2 = vld [vmem:[%s1565_s2] sm:$0xff] (!%p240_p2)  ;;  %v1032_v4 = vmov (!%p240_p2), 4   ;;  %v302_v5 = vld [vmem:[%s1565_s2 + $0x8] sm:$0xff] (!%p240_p2) }
   0x6   : > { %243 = sbr.rel (%p240_p2) target bundleno = 672 (0x2a0), region = 48  ;;  %p274_p3 = scmp.lt.s32.totalorder (!%p240_p2), %s955_s26, 3  ;;  %388 = vmatprep.mubr.f32.mxu0 (!%p240_p2), %v1030_v0  ;;  %1003 = vset.pattern.permute.xlu0 (!%p240_p2), %v1031_v1  ;;  %v1106_v3 = vld [vmem:[%s1566_s3] sm:$0xff] (!%p240_p2)  ;;  %v300_v6 = vld [vmem:[%s1566_s3 + $0x8] sm:$0xff] (!%p240_p2)  ;;  %v1033_v13 = vmov (!%p240_p2), 1   ;;  %vm1571_vm0 = vcmask (!%p240_p2), 130048  }
   0x7   : > { %309 = vperm.xlu0 (!%p240_p2), %1003, %v301_v2   ;;  %1004 = vset.pattern.permute.xlu1 (!%p240_p2), %v1032_v4  ;;  %v295_v14 = vld [vmem:[%s1564_s1] sm:$0xff] (!%p240_p2)  ;;  %v296_v15 = vld [vmem:[%s1564_s1 + $0x8] sm:$0xff] (!%p240_p2)  ;;  %v1034_v16 = vmov (!%p240_p2), 2   ;;  %v1035_v17 = vmov (!%p240_p2), 3   ;;  %v1036_v18 = vmov (!%p240_p2), 5   ;;  %v1037_v19 = vmov (!%p240_p2), 6  }
   0x8   : > { %412 = vperm.xlu1 (!%p240_p2), %1004, %v1106_v3   ;;  %834 = vmatprep.mubr.f32.mxu1 (!%p240_p2), %v1030_v0  ;;  %v1038_v20 = vmov (!%p240_p2), 7   ;;  %v1039_v21 = vmov (!%p240_p2), 8   ;;  %v304_v22 = vld [vmem:[%s1567_s4 + $0x8] sm:$0xff] (!%p240_p2)  ;;  %v303_v23 = vld [vmem:[%s1567_s4] sm:$0xff] (!%p240_p2)  ;;  %s1041_s27 = smov (!%p240_p2), 16   ;;  %s1042_s28 = smov (!%p240_p2), 15  }
   0x9   : > { %s1043_s29 = smov (!%p240_p2), 127   ;;  %s1044_s30 = smov (!%p240_p2), 1   ;;  %v305_v38 = vld [vmem:[%s1569_s6] sm:$0xff] (!%p240_p2)  ;;  %v306_v47 = vld [vmem:[%s1569_s6 + $0x8] sm:$0xff] (!%p240_p2) }
   0xa   : > { %s1045_s8 = smov (!%p240_p2), 113   ;;  %s1046_s9 = smov (!%p240_p2), 112  }
   0xb   : > { %314 = vperm.xlu0 (!%p240_p2), %1003, %v302_v5   ;;  %s1047_s10 = smov (!%p240_p2), 111   ;;  %s958_s20 = sshll.u32 (!%p240_p2), %s950_s25, 2 }
   0xc   : > { %417 = vperm.xlu1 (!%p240_p2), %1004, %v300_v6   ;;  %p281_p4 = scmp.lt.s32.totalorder (!%p240_p2), %s958_s20, 7 }
   0xd   : > { %s1597_s26 = smov (!%p274_p3, %s955_s26), 3 }
   0xe   : > { %s967_s12 = sshll.u32 %s1597_s26, 5  ;;  %s1040_s26 = smov 17  }
   0xf   : > { %s1119_s15 = scalar_lea.vmem %s1563_s0, %s967_s12  ;;  %1006 = vset.pattern.permute.xlu0 %v1033_v13  ;;  %s1599_s20 = smov (!%p281_p4, %s958_s20), 7 }
  0x10   : > { %v290_v7 = vld [vmem:[%s1119_s15 + $0x18] sm:$0xff]  ;;  %v289_v9 = vld [vmem:[%s1119_s15 + $0x10] sm:$0xff]  ;;  %1005 = vset.pattern.permute.xlu1 %v1031_v1  ;;  %489 = vperm.xlu0 %1006, %v1106_v3   ;;  %s968_s21 = sshll.u32 %s1599_s20, 4 }
  0x11   : > { %v294_v8 = vld [vmem:[%s1119_s15 + $0x38] sm:$0xff]  ;;  %v293_v11 = vld [vmem:[%s1119_s15 + $0x30] sm:$0xff]  ;;  %456 = vperm.xlu1 %1005, %v300_v6   ;;  %s1540_s25 = scalar_lea.vmem %s1570_s7, %s968_s21 }
  0x12   : > { %v969_v10 = vpack.c.bf16 %v294_v8, %v290_v7  ;;  %v971_v12 = vpack.c.bf16 %v293_v11, %v289_v9 }
  0x14   : > { %970 = vmatprep.subr.bf16.mxu0 %v969_v10  ;;  %1009 = vset.pattern.permute.xlu0 %v1034_v16 }
  0x15   : > { %972 = vmatpush1.bf16.msra.mxu0 %v971_v12  ;;  %1007 = vset.pattern.permute.xlu1 %v1033_v13 }
  0x16   : > { %493 = vperm.xlu1 %1007, %v300_v6   ;;  %534 = vperm.xlu0 %1009, %v300_v6  }
  0x18   : > { %961 = vmatmul.mubr.msk.f32.vlgmr.msra.gmra.mrb[0].mxu0 %vm1571_vm0, %v295_v14 }
  0x19   : > { %394 = vmatprep.mubr.f32.mxu0 %v1030_v0 }
  0x1a   : > { %1008 = vset.pattern.permute.xlu1 %v1034_v16  ;;  %1010 = vset.pattern.permute.xlu0 %v1035_v17 }
  0x1b   : > { %530 = vperm.xlu1 %1008, %v1106_v3   ;;  %567 = vperm.xlu0 %1010, %v1106_v3  }
  0x1c   : > { %962 = vmatmul.mubr.msk.f32.gmra.mrb[2].mxu0 %vm1571_vm0, %v296_v15 }
  0x1f   : > { %1011 = vset.pattern.permute.xlu1 %v1035_v17  ;;  %1013 = vset.pattern.permute.xlu0 %v1036_v18 }
  0x20   : > { %571 = vperm.xlu1 %1011, %v300_v6   ;;  %608 = vperm.xlu0 %1013, %v300_v6  }
  0x24   : > { %1012 = vset.pattern.permute.xlu1 %v1036_v18  ;;  %1014 = vset.pattern.permute.xlu0 %v1037_v19 }
  0x25   : > { %604 = vperm.xlu1 %1012, %v1106_v3   ;;  %645 = vperm.xlu0 %1014, %v1106_v3  }
  0x29   : > { %1015 = vset.pattern.permute.xlu1 %v1037_v19  ;;  %1017 = vset.pattern.permute.xlu0 %v1038_v20 }
  0x2a   : > { %649 = vperm.xlu1 %1015, %v300_v6   ;;  %686 = vperm.xlu0 %1017, %v300_v6  }
  0x2e   : > { %1016 = vset.pattern.permute.xlu1 %v1038_v20  ;;  %1018 = vset.pattern.permute.xlu0 %v1039_v21 }
  0x2f   : > { %682 = vperm.xlu1 %1016, %v1106_v3   ;;  %721 = vperm.xlu0 %1018, %v1106_v3  }
  0x33   : > { %1020 = vset.pattern.permute.xlu1 %v1039_v21  ;;  %1019 = vset.pattern.permute.xlu0 %v1031_v1 }
  0x34   : > { %725 = vperm.xlu1 %1020, %v300_v6   ;;  %452 = vperm.xlu0 %1019, %v1106_v3  }
  0x38   : > { %1021 = vset.pattern.permute.xlu1 %v1031_v1  ;;  %743 = vperm.xlu0 %1019, %v304_v22   ;;  %v405_v1 = vlaneseq }
  0x39   : > { %738 = vperm.xlu1 %1021, %v303_v23  }
  0x3a   : > { %v1247_v4 = vand.u32 127, %v405_v1 }
  0x3c   : > { %v1252_v7 = vadd.s32 128, %v1247_v4  ;;  %v408_v10 = vand.u32 15, %v1247_v4  ;;  %vm432_vm1 = vcmp.lt.s32.totalorder %v1247_v4, 17  ;;  %vm437_vm2 = vcmp.ge.s32.totalorder %v1247_v4, 16 }
  0x3d   : > { %vm1573_vm6 = vcmp.lt.s32.totalorder %v1247_v4, 15  ;;  %vm1572_vm10 = vcmp.lt.s32.totalorder %v1247_v4, 127  ;;  %vm475_vm11 = vcmp.lt.s32.totalorder %v1247_v4, 16  ;;  %vm553_vm12 = vcmp.lt.s32.totalorder %v1247_v4, 1 }
  0x3e   : > { %v409_v11 = vand.u32 15, %v1252_v7  ;;  %vm1264_vm3 = vcmp.ge.s32.totalorder %v408_v10, 1  ;;  %vm1291_vm7 = vcmp.lt.s32.totalorder %v408_v10, 15  ;;  %vm633_vm13 = vcmp.lt.s32.totalorder %v1252_v7, 240 }
  0x3f   : > { %vm1280_vm5 = vmand %vm437_vm2, %vm1264_vm3  ;;  %vm627_vm14 = vcmp.lt.s32.totalorder %v1247_v4, 113  ;;  %vm668_vm0 = vcmp.lt.s32.totalorder %v1247_v4, 112 }
  0x40   : > { %vm1268_vm4 = vcmp.ge.s32.totalorder %v409_v11, 1  ;;  %vm1301_vm8 = vcmp.lt.s32.totalorder %v409_v11, 15  ;;  %vm1309_vm9 = vmand %vm437_vm2, %vm1291_vm7 }
  0x41   : > { %vm1370_vm15 = vmand %vm633_vm13, %vm1268_vm4 }
  0x86   : > { %v310_v24 = vpop.permute.xlu0 %309 }
  0x87   : > { %v1194_v39 = vpop.permute.xlu1 %412 }
  0x8a   : > { %v315_v33 = vpop.permute.xlu0 %314 }
  0x8b   : > { %v1198_v40 = vpop.permute.xlu1 %417 }
  0x8f   : > { %v1206_v42 = vpop.permute.xlu0 %489 }
  0x90   : > { %v1204_v41 = vpop.permute.xlu1 %456 }
  0x95   : > { %v1210_v43 = vpop.permute.xlu1 %493  ;;  %v1212_v44 = vpop.permute.xlu0 %534 }
  0x9a   : > { %v1217_v45 = vpop.permute.xlu1 %530  ;;  %v1219_v46 = vpop.permute.xlu0 %567 }
  0x9f   : > { %v1225_v48 = vpop.permute.xlu1 %571  ;;  %v1227_v49 = vpop.permute.xlu0 %608 }
  0xa4   : > { %v1229_v50 = vpop.permute.xlu1 %604  ;;  %v1231_v51 = vpop.permute.xlu0 %645 }
  0xa9   : > { %v1233_v52 = vpop.permute.xlu1 %649  ;;  %v1235_v53 = vpop.permute.xlu0 %686 }
  0xae   : > { %v1237_v54 = vpop.permute.xlu1 %682  ;;  %v1239_v55 = vpop.permute.xlu0 %721 }
  0xb3   : > { %v1241_v56 = vpop.permute.xlu1 %725  ;;  %v453_v57 = vpop.permute.xlu0 %452 }
  0xb7   : > { %v1245_v59 = vpop.permute.xlu0 %743 }
  0xb8   : > { %v1243_v58 = vpop.permute.xlu1 %738 }
  0xeb   : > { %v390_v25 = vpop.f32.mrb[0].mxu0 }
  0xec   : > { %v391_v26 = vadd.f32 %v390_v25, %v310_v24  ;;  %v392_v27 = vpop.f32.mrb[1].mxu0 }
  0xed   : > { %v393_v28 = vadd.f32 %v392_v27, %v310_v24 }
  0xee   : > { %v1151_v29 = vmax.f32 %v391_v26, 0.0 }
  0xef   : > { %v1153_v30 = vmax.f32 %v393_v28, 0.0  ;;  %v396_v31 = vpop.f32.mrb[2].mxu0 }
  0xf0   : > { %v398_v32 = vpop.f32.mrb[3].mxu0  ;;  %424 = vrot.lane.b32.xlu1 %v1151_v29, %s1040_s26  ;;  %v397_v34 = vadd.f32 %v396_v31, %v315_v33 }
  0xf1   : > { %428 = vrot.lane.b32.xlu0 %v1153_v30, %s1040_s26  ;;  %v399_v36 = vadd.f32 %v398_v32, %v315_v33 }
  0xf2   : > { %v1166_v35 = vmax.f32 %v397_v34, 0.0  ;;  %v420_v34 = vmul.f32 %v1194_v39, %v1151_v29 }
  0xf3   : > { %v1177_v37 = vmax.f32 %v399_v36, 0.0  ;;  %v421_v36 = vmul.f32 %v1194_v39, %v1153_v30 }
  0xf4   : > { %467 = vrot.lane.b32.xlu1 %v1151_v29, %s1041_s27 }
  0xf5   : > { %508 = vrot.lane.b32.xlu0 %v1153_v30, %s1042_s28 }
  0xf8   : > { %504 = vrot.lane.b32.xlu1 %v1151_v29, %s1042_s28 }
  0xf9   : > { %586 = vrot.lane.b32.xlu0 %v1153_v30, %s1043_s29 }
  0xfc   : > { %545 = vrot.lane.b32.xlu1 %v1151_v29, %s1044_s30 }
  0xfd   : > { %469 = vrot.lane.b32.xlu0 %v1166_v35, %s1041_s27 }
 0x100   : > { %582 = vrot.lane.b32.xlu1 %v1151_v29, %s1043_s29 }
 0x101   : > { %547 = vrot.lane.b32.xlu0 %v1166_v35, %s1044_s30 }
 0x104   : > { %619 = vrot.lane.b32.xlu1 %v1151_v29, %s1045_s8 }
 0x105   : > { %621 = vrot.lane.b32.xlu0 %v1166_v35, %s1045_s8 }
 0x108   : > { %660 = vrot.lane.b32.xlu1 %v1151_v29, %s1046_s9 }
 0x109   : > { %662 = vrot.lane.b32.xlu0 %v1166_v35, %s1046_s9 }
 0x10c   : > { %697 = vrot.lane.b32.xlu1 %v1151_v29, %s1047_s10 }
 0x10d   : > { %473 = vrot.lane.b32.xlu0 %v1177_v37, %s1041_s27 }
 0x110   : > { %471 = vrot.lane.b32.xlu1 %v1153_v30, %s1041_s27 }
 0x111   : > { %551 = vrot.lane.b32.xlu0 %v1177_v37, %s1044_s30 }
 0x114   : > { %549 = vrot.lane.b32.xlu1 %v1153_v30, %s1044_s30 }
 0x115   : > { %625 = vrot.lane.b32.xlu0 %v1177_v37, %s1045_s8 }
 0x118   : > { %623 = vrot.lane.b32.xlu1 %v1153_v30, %s1045_s8 }
 0x119   : > { %666 = vrot.lane.b32.xlu0 %v1177_v37, %s1046_s9 }
 0x11c   : > { %664 = vrot.lane.b32.xlu1 %v1153_v30, %s1046_s9 }
 0x11d   : > { %701 = vrot.lane.b32.xlu0 %v1153_v30, %s1047_s10 }
 0x120   : > { %426 = vrot.lane.b32.xlu1 %v1166_v35, %s1040_s26 }
 0x121   : > { %756 = vperm.xlu0 %1019, %v305_v38  }
 0x124   : > { %506 = vrot.lane.b32.xlu1 %v1166_v35, %s1042_s28 }
 0x128   : > { %584 = vrot.lane.b32.xlu1 %v1166_v35, %s1043_s29 }
 0x12c   : > { %430 = vrot.lane.b32.xlu1 %v1177_v37, %s1040_s26 }
 0x130   : > { %510 = vrot.lane.b32.xlu1 %v1177_v37, %s1042_s28 }
 0x134   : > { %588 = vrot.lane.b32.xlu1 %v1177_v37, %s1043_s29 }
 0x138   : > { %699 = vrot.lane.b32.xlu1 %v1166_v35, %s1047_s10 }
 0x13c   : > { %703 = vrot.lane.b32.xlu1 %v1177_v37, %s1047_s10 }
 0x140   : > { %761 = vperm.xlu1 %1021, %v306_v47  }
 0x162   : > { %v425_v60 = vpop.permute.xlu1 %424 }
 0x163   : > { %v429_v61 = vpop.permute.xlu0 %428 }
 0x164   : > { %v433_v16 = vsel %vm432_vm1, %v425_v60, %v429_v61  ;;  %v435_v19 = vsel %vm432_vm1, %v429_v61, %v425_v60 }
 0x165   : > { %v448_v21 = vsel %vm1268_vm4, %v433_v16, 0.0  ;;  %v447_v23 = vsel %vm1280_vm5, %v435_v19, 0.0 }
 0x166   : > { %v468_v62 = vpop.permute.xlu1 %467  ;;  %v460_v26 = vmul.f32 %v453_v57, %v448_v21  ;;  %v459_v33 = vmul.f32 %v453_v57, %v447_v23 }
 0x167   : > { %v509_v63 = vpop.permute.xlu0 %508 }
 0x168   : > { %v464_v29 = vadd.f32 %v460_v26, %v421_v36 }
 0x16a   : > { %v505_v2 = vpop.permute.xlu1 %504 }
 0x16b   : > { %v587_v3 = vpop.permute.xlu0 %586  ;;  %v513_v31 = vsel %vm1573_vm6, %v505_v2, %v509_v63  ;;  %v515_v32 = vsel %vm1573_vm6, %v509_v63, %v505_v2  ;;  %v463_v2 = vadd.f32 %v459_v33, %v420_v34  ;;  %vm1398_vm6 = vmand %vm633_vm13, %vm1301_vm8 }
 0x16c   : > { %v525_v47 = vsel %vm1309_vm9, %v515_v32, 0.0  ;;  %v526_v60 = vsel %vm1301_vm8, %v513_v31, 0.0 }
 0x16d   : > { %v537_v16 = vmul.f32 %v1217_v45, %v525_v47 }
 0x16e   : > { %v546_v5 = vpop.permute.xlu1 %545 }
 0x16f   : > { %v1249_v6 = vpop.permute.xlu0 %469 }
 0x172   : > { %v583_v8 = vpop.permute.xlu1 %582 }
 0x173   : > { %v1254_v9 = vpop.permute.xlu0 %547  ;;  %v591_v30 = vsel %vm1572_vm10, %v583_v8, %v587_v3  ;;  %v593_v10 = vsel %vm1572_vm10, %v587_v3, %v583_v8  ;;  %vm705_vm10 = vcmp.lt.s32.totalorder %v1247_v4, 111 }
 0x174   : > { %v599_v23 = vsel %vm1291_vm7, %v591_v30, 0.0 }
 0x175   : > { %v611_v47 = vmul.f32 %v1229_v50, %v599_v23 }
 0x176   : > { %v1258_v12 = vpop.permute.xlu1 %619 }
 0x177   : > { %v1261_v13 = vpop.permute.xlu0 %621 }
 0x17a   : > { %v1274_v17 = vpop.permute.xlu1 %660 }
 0x17b   : > { %v1286_v20 = vpop.permute.xlu0 %662 }
 0x17e   : > { %v1297_v24 = vpop.permute.xlu1 %697 }
 0x17f   : > { %v1299_v25 = vpop.permute.xlu0 %473 }
 0x182   : > { %v472_v38 = vpop.permute.xlu1 %471 }
 0x183   : > { %v476_v57 = vsel %vm475_vm11, %v468_v62, %v472_v38  ;;  %v478_v61 = vsel %vm475_vm11, %v472_v38, %v468_v62  ;;  %v1331_v63 = vpop.permute.xlu0 %551  ;;  %v538_v62 = vmul.f32 %v1217_v45, %v526_v60 }
 0x184   : > { %v484_v39 = vsel %vm437_vm2, %v478_v61, 0.0  ;;  %v497_v1 = vmul.f32 %v1206_v42, %v476_v57 }
 0x185   : > { %v496_v11 = vmul.f32 %v1206_v42, %v484_v39  ;;  %v600_v42 = vsel %vm1301_vm8, %v593_v10, 0.0 }
 0x186   : > { %v501_v19 = vadd.f32 %v497_v1, %v464_v29  ;;  %v550_v21 = vpop.permute.xlu1 %549  ;;  %v612_v60 = vmul.f32 %v1229_v50, %v600_v42 }
 0x187   : > { %v500_v26 = vadd.f32 %v496_v11, %v463_v2  ;;  %v554_v31 = vsel %vm553_vm12, %v546_v5, %v550_v21  ;;  %v556_v3 = vsel %vm553_vm12, %v550_v21, %v546_v5  ;;  %v1350_v8 = vpop.permute.xlu0 %625 }
 0x188   : > { %v542_v45 = vadd.f32 %v538_v62, %v501_v19  ;;  %v562_v32 = vsel %vm1264_vm3, %v556_v3, 0.0  ;;  %v563_v33 = vsel %vm1268_vm4, %v554_v31, 0.0 }
 0x189   : > { %v541_v34 = vadd.f32 %v537_v16, %v500_v26  ;;  %v574_v36 = vmul.f32 %v1219_v46, %v562_v32  ;;  %v575_v38 = vmul.f32 %v1219_v46, %v563_v33 }
 0x18a   : > { %v624_v5 = vpop.permute.xlu1 %623 }
 0x18b   : > { %v578_v57 = vadd.f32 %v574_v36, %v541_v34  ;;  %v579_v61 = vadd.f32 %v575_v38, %v542_v45  ;;  %v1364_v29 = vpop.permute.xlu0 %666  ;;  %v628_v46 = vsel %vm627_vm14, %v1258_v12, %v624_v5  ;;  %v630_v50 = vsel %vm627_vm14, %v624_v5, %v1258_v12 }
 0x18c   : > { %v640_v2 = vsel %vm1264_vm3, %v628_v46, 0.0  ;;  %v641_v10 = vsel %vm1370_vm15, %v630_v50, 0.0  ;;  %v479_v50 = vsel %vm475_vm11, %v1299_v25, %v1249_v6 }
 0x18d   : > { %v616_v39 = vadd.f32 %v612_v60, %v579_v61  ;;  %v615_v1 = vadd.f32 %v611_v47, %v578_v57  ;;  %v652_v11 = vmul.f32 %v1231_v51, %v640_v2  ;;  %v653_v16 = vmul.f32 %v1231_v51, %v641_v10 }
 0x18e   : > { %v665_v62 = vpop.permute.xlu1 %664  ;;  %v557_v2 = vsel %vm553_vm12, %v1331_v63, %v1254_v9 }
 0x18f   : > { %v669_v12 = vsel %vm668_vm0, %v1274_v17, %v665_v62  ;;  %v671_v19 = vsel %vm668_vm0, %v665_v62, %v1274_v17  ;;  %v702_v51 = vpop.permute.xlu0 %701  ;;  %v656_v23 = vadd.f32 %v652_v11, %v615_v1  ;;  %v657_v3 = vadd.f32 %v653_v16, %v616_v39 }
 0x190   : > { %v678_v26 = vsel %vm633_vm13, %v671_v19, 0.0  ;;  %v689_v31 = vmul.f32 %v1237_v54, %v669_v12  ;;  %v706_v17 = vsel %vm705_vm10, %v1297_v24, %v702_v51  ;;  %v708_v45 = vsel %vm705_vm10, %v702_v51, %v1297_v24 }
 0x191   : > { %v690_v42 = vmul.f32 %v1237_v54, %v678_v26  ;;  %v716_v33 = vsel %vm1291_vm7, %v706_v17, 0.0  ;;  %v717_v34 = vsel %vm1398_vm6, %v708_v45, 0.0  ;;  %v486_v39 = vsel %vm437_vm2, %v479_v50, 0.0 }
 0x192   : > { %v693_v32 = vadd.f32 %v689_v31, %v656_v23  ;;  %v427_v36 = vpop.permute.xlu1 %426  ;;  %v728_v5 = vmul.f32 %v1239_v55, %v716_v33  ;;  %v729_v54 = vmul.f32 %v1239_v55, %v717_v34  ;;  %v477_v55 = vsel %vm475_vm11, %v1249_v6, %v1299_v25 }
 0x193   : > { %v694_v38 = vadd.f32 %v690_v42, %v657_v3  ;;  %v422_v25 = vmul.f32 %v1198_v40, %v1166_v35  ;;  %v423_v62 = vmul.f32 %v1198_v40, %v1177_v37  ;;  %v498_v19 = vmul.f32 %v1210_v43, %v486_v39 }
 0x194   : > { %v732_v47 = vadd.f32 %v728_v5, %v693_v32  ;;  %v564_v35 = vsel %vm1264_vm3, %v557_v2, 0.0  ;;  %v629_v51 = vsel %vm627_vm14, %v1261_v13, %v1350_v8 }
 0x195   : > { %v733_v60 = vadd.f32 %v729_v54, %v694_v38  ;;  %v576_v32 = vmul.f32 %v1225_v48, %v564_v35  ;;  %v642_v34 = vsel %vm1264_vm3, %v629_v51, 0.0  ;;  %v287_v51 = vld [vmem:[%s1119_s15] sm:$0xff] }
 0x196   : > { %v507_v57 = vpop.permute.xlu1 %506  ;;  %v1422_v24 = vadd.f32 %v1243_v58, %v732_v47  ;;  %v654_v30 = vmul.f32 %v1233_v52, %v642_v34  ;;  %v292_v34 = vld [vmem:[%s1119_s15 + $0x28] sm:$0xff] }
 0x197   : > { %v1419_v61 = vadd.f32 %v1243_v58, %v733_v60  ;;  %v555_v58 = vsel %vm553_vm12, %v1254_v9, %v1331_v63  ;;  %v499_v9 = vmul.f32 %v1210_v43, %v477_v55  ;;  %v631_v43 = vsel %vm627_vm14, %v1350_v8, %v1261_v13 }
 0x198   : > { %v565_v18 = vsel %vm1268_vm4, %v555_v58, 0.0  ;;  %v643_v5 = vsel %vm1370_vm15, %v631_v43, 0.0  ;;  %v859_v43 = vrot.slane %v287_v51, 4 }
 0x199   : > { %v577_v33 = vmul.f32 %v1225_v48, %v565_v18  ;;  %v655_v50 = vmul.f32 %v1233_v52, %v643_v5 }
 0x19a   : > { %v585_v46 = vpop.permute.xlu1 %584 }
 0x19e   : > { %v431_v1 = vpop.permute.xlu1 %430 }
 0x19f   : > { %v434_v10 = vsel %vm432_vm1, %v427_v36, %v431_v1  ;;  %v436_v6 = vsel %vm432_vm1, %v431_v1, %v427_v36  ;;  %vm1590_vm1 = vcmp.lt.s32.totalorder %v1247_v4, 15  ;;  %v670_v1 = vsel %vm668_vm0, %v1286_v20, %v1364_v29 }
 0x1a0   : > { %v449_v11 = vsel %vm1280_vm5, %v436_v6, 0.0  ;;  %v450_v16 = vsel %vm1268_vm4, %v434_v10, 0.0  ;;  %vm1591_vm2 = vmmov %vm1590_vm1  ;;  %vm1592_vm4 = vcmp.lt.s32.totalorder %v1247_v4, 127 }
 0x1a1   : > { %v461_v63 = vmul.f32 %v1204_v41, %v449_v11  ;;  %v462_v12 = vmul.f32 %v1204_v41, %v450_v16  ;;  %vm1593_vm5 = vmmov %vm1592_vm4 }
 0x1a2   : > { %v511_v37 = vpop.permute.xlu1 %510 }
 0x1a3   : > { %v465_v40 = vadd.f32 %v461_v63, %v422_v25  ;;  %v466_v23 = vadd.f32 %v462_v12, %v423_v62  ;;  %v514_v26 = vsel %vm1590_vm1, %v507_v57, %v511_v37  ;;  %v516_v41 = vsel %vm1591_vm2, %v511_v37, %v507_v57 }
 0x1a4   : > { %v527_v15 = vsel %vm1309_vm9, %v516_v41, 0.0  ;;  %v528_v31 = vsel %vm1301_vm8, %v514_v26, 0.0  ;;  %v751_v12 = vmax.f32 %v1419_v61, 0.0  ;;  %v757_v61 = vpop.permute.xlu0 %756 }
 0x1a5   : > { %v502_v3 = vadd.f32 %v498_v19, %v465_v40  ;;  %v503_v42 = vadd.f32 %v499_v9, %v466_v23  ;;  %v539_v17 = vmul.f32 %v1212_v44, %v527_v15  ;;  %v540_v45 = vmul.f32 %v1212_v44, %v528_v31  ;;  %v288_v23 = vld [vmem:[%s1119_s15 + $0x8] sm:$0xff] }
 0x1a6   : > { %v589_v13 = vpop.permute.xlu1 %588  ;;  %v672_v44 = vsel %vm668_vm0, %v1364_v29, %v1286_v20  ;;  %v750_v19 = vmax.f32 %v1422_v24, 0.0  ;;  %vm1594_vm0 = vcmask 130048  }
 0x1a7   : > { %v543_v8 = vadd.f32 %v539_v17, %v502_v3  ;;  %v544_v28 = vadd.f32 %v540_v45, %v503_v42  ;;  %v592_v36 = vsel %vm1592_vm4, %v585_v46, %v589_v13  ;;  %v594_v38 = vsel %vm1593_vm5, %v589_v13, %v585_v46  ;;  %vm1595_vm3 = vmmov %vm1594_vm0  ;;  %v291_v17 = vld [vmem:[%s1119_s15 + $0x20] sm:$0xff] }
 0x1a8   : > { %v601_v48 = vsel %vm1291_vm7, %v592_v36, 0.0  ;;  %v602_v14 = vsel %vm1301_vm8, %v594_v38, 0.0  ;;  %v680_v27 = vsel %vm633_vm13, %v672_v44, 0.0  ;;  %v860_v42 = vrot.slane %v288_v23, 4 }
 0x1a9   : > { %v580_v54 = vadd.f32 %v576_v32, %v543_v8  ;;  %v581_v47 = vadd.f32 %v577_v33, %v544_v28  ;;  %v613_v60 = vmul.f32 %v1227_v49, %v601_v48  ;;  %v614_v57 = vmul.f32 %v1227_v49, %v602_v14 }
 0x1aa   : > { %v700_v46 = vpop.permute.xlu1 %699  ;;  %v691_v49 = vmul.f32 %v1235_v53, %v670_v1  ;;  %v692_v6 = vmul.f32 %v1235_v53, %v680_v27  ;;  %v871_v5 = vrot.slane %v291_v17, 4 }
 0x1ab   : > { %v617_v55 = vadd.f32 %v613_v60, %v580_v54  ;;  %v618_v39 = vadd.f32 %v614_v57, %v581_v47  ;;  %v872_v54 = vrot.slane %v292_v34, 4 }
 0x1ad   : > { %v658_v58 = vadd.f32 %v654_v30, %v617_v55  ;;  %v659_v2 = vadd.f32 %v655_v50, %v618_v39 }
 0x1ae   : > { %v704_v10 = vpop.permute.xlu1 %703 }
 0x1af   : > { %v707_v52 = vsel %vm705_vm10, %v700_v46, %v704_v10  ;;  %v709_v25 = vsel %vm705_vm10, %v704_v10, %v700_v46  ;;  %v695_v20 = vadd.f32 %v691_v49, %v658_v58  ;;  %v696_v62 = vadd.f32 %v692_v6, %v659_v2 }
 0x1b0   : > { %v718_v11 = vsel %vm1291_vm7, %v707_v52, 0.0  ;;  %v719_v7 = vsel %vm1398_vm6, %v709_v25, 0.0  ;;  %vm875_vm6 = vcmask 1043456  }
 0x1b1   : > { %v730_v29 = vmul.f32 %v1241_v56, %v718_v11  ;;  %v731_v16 = vmul.f32 %v1241_v56, %v719_v7  ;;  %v297_v56 = vld [vmem:[%s1568_s5] sm:$0xff] }
 0x1b3   : > { %v734_v9 = vadd.f32 %v730_v29, %v695_v20  ;;  %v735_v53 = vadd.f32 %v731_v16, %v696_v62 }
 0x1b5   : > { %v749_v63 = vadd.f32 %v1245_v59, %v735_v53  ;;  %v748_v4 = vadd.f32 %v1245_v59, %v734_v9  ;;  %v298_v59 = vld [vmem:[%s1568_s5 + $0x8] sm:$0xff] }
 0x1b7   : > { %v753_v22 = vmax.f32 %v749_v63, 0.0  ;;  %v752_v21 = vmax.f32 %v748_v4, 0.0 }
 0x1b9   : > { %v973_v35 = vpack.c.bf16 %v753_v22, %v751_v12  ;;  %v975_v18 = vpack.c.bf16 %v752_v21, %v750_v19 }
 0x1bb   : > { %974 = vmatprep.subr.bf16.mxu1 %v973_v35 }
 0x1bc   : > { %976 = vmatpush1.bf16.msra.mxu1 %v975_v18 }
 0x1bf   : > { %963 = vmatmul.mubr.msk.f32.vlgmr.msra.gmra.mrb[0].mxu1 %vm1594_vm0, %v297_v56  ;;  %v762_v41 = vpop.permute.xlu1 %761 }
 0x1c0   : > { %840 = vmatprep.mubr.f32.mxu1 %v1030_v0 }
 0x1c3   : > { %964 = vmatmul.mubr.msk.f32.gmra.mrb[2].mxu1 %vm1595_vm3, %v298_v59 }
 0x292   : > { %v836_v24 = vpop.f32.mrb[0].mxu1 }
 0x293   : > { %v837_v37 = vadd.f32 %v836_v24, %v757_v61  ;;  %v838_v40 = vpop.f32.mrb[1].mxu1 }
 0x294   : > { %v839_v0 = vadd.f32 %v838_v40, %v757_v61 }
 0x295   : > { %v847_v26 = vmax.f32 %v837_v37, 0.0 }
 0x296   : > { %v848_v15 = vmax.f32 %v839_v0, 0.0  ;;  %v842_v31 = vpop.f32.mrb[2].mxu1 }
 0x297   : > { %v853_v3 = vrot.slane %v847_v26, 4  ;;  %v843_v45 = vadd.f32 %v842_v31, %v762_v41  ;;  %v844_v32 = vpop.f32.mrb[3].mxu1  ;;  %v878_v36 = vsel %vm875_vm6, %v859_v43, %v847_v26 }
 0x298   : > { %v854_v33 = vrot.slane %v848_v15, 4  ;;  %v845_v13 = vadd.f32 %v844_v32, %v762_v41  ;;  %886 = vst [vmem:[%s1540_s25 + $0x10] sm:$0xff] %v878_v36  ;;  %v879_v48 = vsel %vm875_vm6, %v860_v42, %v848_v15 }
 0x299   : > { %v876_v8 = vsel %vm875_vm6, %v287_v51, %v853_v3  ;;  %v849_v28 = vmax.f32 %v843_v45, 0.0  ;;  %887 = vst [vmem:[%s1540_s25 + $0x18] sm:$0xff] %v879_v48 }
 0x29a   : > { %884 = vst [vmem:[%s1540_s25] sm:$0xff] %v876_v8  ;;  %v877_v38 = vsel %vm875_vm6, %v288_v23, %v854_v33  ;;  %v850_v44 = vmax.f32 %v845_v13, 0.0 }
 0x29b   : > { %885 = vst [vmem:[%s1540_s25 + $0x8] sm:$0xff] %v877_v38  ;;  %v865_v14 = vrot.slane %v849_v28, 4  ;;  %v882_v57 = vsel %vm875_vm6, %v871_v5, %v849_v28 }
 0x29c   : > { %v866_v47 = vrot.slane %v850_v44, 4  ;;  %890 = vst [vmem:[%s1540_s25 + $0x30] sm:$0xff] %v882_v57  ;;  %v883_v30 = vsel %vm875_vm6, %v872_v54, %v850_v44 }
 0x29d   : > { %v880_v60 = vsel %vm875_vm6, %v291_v17, %v865_v14  ;;  %891 = vst [vmem:[%s1540_s25 + $0x38] sm:$0xff] %v883_v30 }
 0x29e   : > { %888 = vst [vmem:[%s1540_s25 + $0x20] sm:$0xff] %v880_v60  ;;  %v881_v46 = vsel %vm875_vm6, %v292_v34, %v866_v47 }
 0x29f   : > { %889 = vst [vmem:[%s1540_s25 + $0x28] sm:$0xff] %v881_v46 }
 0x2a0 PF: > { %s17_s24 = sadd.s32 1, %s1028_s24  }
 0x2a1   : > { %p14_p5 = scmp.ge.s32.totalorder %s17_s24, 4  }
 0x2a3   :  { %16 = sbr.rel (!%p14_p5) target bundleno = 1 (0x1), region = 78 }

</bundles_post_ra>
